<compile_context>
chip_gen: v7x
topology: tpu7x:2x2x1
jax: 0.10.0
libtpu: 0.0.40
codegen_flags: <defaults>
</compile_context>

<pallas_src>
import jax
import jax.numpy as jnp
from jax.experimental import pallas as pl
from jax.experimental.pallas import tpu as pltpu

EPS = 1e-5  # BatchNorm2d eps


def _round_up(x, m):
    return ((x + m - 1) // m) * m


def conv_stats_kernel(p_ref, w_ref, y_ref, stats_ref):
    # im2col GEMM on the MXU: bf16 operands, f32 accumulation.
    y = jnp.dot(p_ref[...], w_ref[...], preferred_element_type=jnp.float32)
    y_ref[...] = y
    # One-pass BN partials per channel: sum(y) and sum(y*y) for this M-tile.
    s1 = jnp.sum(y, axis=0, keepdims=True)        # (1, Cp)
    s2 = jnp.sum(y * y, axis=0, keepdims=True)    # (1, Cp)
    row = jax.lax.broadcasted_iota(jnp.int32, stats_ref.shape, 0)  # (8, Cp)
    stats_ref[...] = jnp.where(row == 0, s1, 0.0) + jnp.where(row == 1, s2, 0.0)


def bn_apply_kernel(y_ref, scale_ref, shift_ref, o_ref):
    # Fused normalize + affine: one FMA per element, all in f32.
    o_ref[...] = (y_ref[...] * scale_ref[...] + shift_ref[...]).astype(o_ref.dtype)


def conv_batchnorm(x_nchw, weight, bias, gamma, beta, *, stride=2, pad=3, tm=512):
    # `bias` is accepted for Conv2d API parity but dropped: it is cancelled by the BN
    # mean subtraction and does not affect the variance, so the forward output is identical.
    del bias
    N, Cin, H, W = x_nchw.shape
    Cout, _, KH, KW = weight.shape
    OH = (H + 2 * pad - KH) // stride + 1
    OW = (W + 2 * pad - KW) // stride + 1

    # ---- wrapper-side layout glue (pure indexing / casts) ----
    x = jnp.transpose(x_nchw, (0, 2, 3, 1)).astype(jnp.bfloat16)   # NHWC, bf16 MXU operand
    x = jnp.pad(x, ((0, 0), (pad, pad), (pad, pad), (0, 0)))
    patches = jnp.stack(
        [x[:, kh:kh + stride * OH:stride, kw:kw + stride * OW:stride, :]
         for kh in range(KH) for kw in range(KW)],
        axis=3,
    )                                                # (N, OH, OW, KH*KW, Cin)
    p = patches.reshape(N * OH * OW, KH * KW * Cin)  # (M, K) bf16
    M, K = p.shape

    # Alignment: lane-dense output (Cout -> 128), aligned contraction dim, M padded to whole
    # tiles. Padded rows are all-zero so they contribute nothing to the BN sums; dividing by
    # the true M keeps the batch statistics exact.
    Cp = _round_up(Cout, 128)
    Kp = _round_up(K, 128)
    TM = min(tm, _round_up(M, 128))   # TM sized so double-buffered tiles fit v7x's 32 MiB scoped VMEM
    Mp = _round_up(M, TM)
    gm = Mp // TM

    p = jnp.pad(p, ((0, Mp - M), (0, Kp - K)))
    w = jnp.transpose(weight, (2, 3, 1, 0)).reshape(K, Cout).astype(jnp.bfloat16)
    w = jnp.pad(w, ((0, Kp - K), (0, Cp - Cout)))

    cparams = pltpu.CompilerParams(
        dimension_semantics=("parallel",),        # independent M tiles -> megacore sharding on v7x
        vmem_limit_bytes=32 * 1024 * 1024,
    )

    # ---- pass 1: tiled conv GEMM + per-tile BN partial sums ----
    y_conv, stats = pl.pallas_call(
        conv_stats_kernel,
        out_shape=(jax.ShapeDtypeStruct((Mp, Cp), jnp.float32),
                   jax.ShapeDtypeStruct((gm * 8, Cp), jnp.float32)),
        grid=(gm,),
        in_specs=[
            pl.BlockSpec((TM, Kp), lambda i: (i, 0)),
            pl.BlockSpec((Kp, Cp), lambda i: (0, 0)),
        ],
        out_specs=(
            pl.BlockSpec((TM, Cp), lambda i: (i, 0)),
            pl.BlockSpec((8, Cp), lambda i: (i, 0)),
        ),
        compiler_params=cparams,
        cost_estimate=pl.CostEstimate(
            flops=2 * Mp * Kp * Cp,
            transcendentals=0,
            bytes_accessed=Mp * Kp * 2 + Kp * Cp * 2 + Mp * Cp * 4 + gm * 8 * Cp * 4,
        ),
    )(p, w)

    # ---- tiny per-channel reduction + affine fold (Cout-sized; done outside the kernels) ----
    totals = stats.reshape(gm, 8, Cp).sum(axis=0)        # row 0: sum(y), row 1: sum(y*y)
    mean = totals[0] / M
    var = jnp.maximum(totals[1] / M - mean * mean, 0.0)  # biased batch variance (training mode)
    g = jnp.pad(gamma.astype(jnp.float32), (0, Cp - Cout))
    b = jnp.pad(beta.astype(jnp.float32), (0, Cp - Cout))
    scale = g * jax.lax.rsqrt(var + EPS)
    shift = b - mean * scale

    # ---- pass 2: fused normalization, lane-dense tiles over M ----
    out = pl.pallas_call(
        bn_apply_kernel,
        out_shape=jax.ShapeDtypeStruct((Mp, Cp), jnp.float32),
        grid=(gm,),
        in_specs=[
            pl.BlockSpec((TM, Cp), lambda i: (i, 0)),
            pl.BlockSpec((1, Cp), lambda i: (0, 0)),
            pl.BlockSpec((1, Cp), lambda i: (0, 0)),
        ],
        out_specs=pl.BlockSpec((TM, Cp), lambda i: (i, 0)),
        compiler_params=cparams,
    )(y_conv, scale.reshape(1, Cp), shift.reshape(1, Cp))

    y = out[:M, :Cout].reshape(N, OH, OW, Cout)
    return jnp.transpose(y, (0, 3, 1, 2))                # back to NCHW
    # TODO(synk): running_mean / running_var update (momentum=0.1, unbiased var) is a
    # training-time stateful side effect of BatchNorm2d, not part of the forward output.


def _reference(x_nchw, weight, bias, gamma, beta):
    y = jax.lax.conv_general_dilated(
        x_nchw.astype(jnp.float32), weight.astype(jnp.float32),
        window_strides=(2, 2), padding=((3, 3), (3, 3)),
        dimension_numbers=("NCHW", "OIHW", "NCHW"),
    ) + bias.reshape(1, -1, 1, 1)
    mean = y.mean(axis=(0, 2, 3), keepdims=True)
    var = ((y - mean) ** 2).mean(axis=(0, 2, 3), keepdims=True)
    return (y - mean) * jax.lax.rsqrt(var + EPS) * gamma.reshape(1, -1, 1, 1) \
        + beta.reshape(1, -1, 1, 1)


if __name__ == "__main__":
    key = jax.random.PRNGKey(0)
    kx, kw, kb = jax.random.split(key, 3)

    # Small shapes consistent with the module: Conv2d(3 -> 64, 7x7, stride 2, pad 3).
    N, Cin, H, W = 2, 3, 16, 16
    Cout, KH, KW = 64, 7, 7

    x = jax.random.normal(kx, (N, Cin, H, W), dtype=jnp.float32)
    weight = jax.random.normal(kw, (Cout, Cin, KH, KW), dtype=jnp.float32) * 0.05
    bias = jax.random.normal(kb, (Cout,), dtype=jnp.float32) * 0.05
    gamma = jnp.ones((Cout,), dtype=jnp.float32)   # BatchNorm affine default init
    beta = jnp.zeros((Cout,), dtype=jnp.float32)

    out = conv_batchnorm(x, weight, bias, gamma, beta)
    out = jax.block_until_ready(out)

    ref = _reference(x, weight, bias, gamma, beta)
    assert out.shape == (N, Cout, H // 2, W // 2), out.shape
    # Tolerance accounts for the bf16 MXU operands (conv accumulation and BN math stay f32).
    assert jnp.allclose(out, ref, atol=2e-2, rtol=2e-2), float(jnp.max(jnp.abs(out - ref)))

    print("KERNEL_OK")
</pallas_src>

<mosaic_0001>
module attributes {stable_mosaic.version = 11 : i64} {
  func.func @conv_stats_kernel(%arg0: i32, %arg1: memref<128x256xbf16, #tpu.memory_space<vmem>>, %arg2: memref<256x128xbf16, #tpu.memory_space<vmem>>, %arg3: memref<128x128xf32, #tpu.memory_space<vmem>>, %arg4: memref<8x128xf32, #tpu.memory_space<vmem>>) attributes {dimension_semantics = [#tpu.dimension_semantics<parallel>], iteration_bounds = array<i64: 1>, scalar_prefetch = 0 : i64, scratch_operands = 0 : i64, tpu.core_type = #tpu.core_type<tc>, window_params = [{transform_indices = @transform_0, window_bounds = array<i64: 128, 256>}, {pipeline_mode = #tpu.pipeline_mode<synchronous>, transform_indices = @transform_1, window_bounds = array<i64: 256, 128>}, {transform_indices = @transform_2, window_bounds = array<i64: 128, 128>}, {transform_indices = @transform_3, window_bounds = array<i64: 8, 128>}]} {
    %c0 = arith.constant 0 : index
    %c0_0 = arith.constant 0 : index
    %0 = vector.load %arg1[%c0, %c0_0] : memref<128x256xbf16, #tpu.memory_space<vmem>>, vector<128x256xbf16>
    %c0_1 = arith.constant 0 : index
    %c0_2 = arith.constant 0 : index
    %1 = vector.load %arg2[%c0_1, %c0_2] : memref<256x128xbf16, #tpu.memory_space<vmem>>, vector<256x128xbf16>
    %cst = arith.constant dense<0.000000e+00> : vector<128x128xf32>
    %2 = tpu.matmul %0, %1, %cst {dimension_numbers = #tpu.dot_dimension_numbers<[1], [0], [0], [1], [0, 0, 1, 1], [], []>} : vector<128x256xbf16>, vector<256x128xbf16>, vector<128x128xf32> -> vector<128x128xf32>
    %c0_3 = arith.constant 0 : index
    %c0_4 = arith.constant 0 : index
    %3 = vector.load %arg3[%c0_3, %c0_4] : memref<128x128xf32, #tpu.memory_space<vmem>>, vector<128x128xf32>
    tpu.vector_store %arg3[%c0_3, %c0_4], %2 {strides = array<i32>} : memref<128x128xf32, #tpu.memory_space<vmem>>, vector<128x128xf32>,
    %cst_5 = arith.constant dense<0.000000e+00> : vector<128xf32>
    %4 = vector.multi_reduction <add>, %2, %cst_5 [0] : vector<128x128xf32> to vector<128xf32>
    %5 = vector.shape_cast %4 : vector<128xf32> to vector<1x128xf32>
    %6 = arith.mulf %2, %2 : vector<128x128xf32>
    %cst_6 = arith.constant dense<0.000000e+00> : vector<128xf32>
    %7 = vector.multi_reduction <add>, %6, %cst_6 [0] : vector<128x128xf32> to vector<128xf32>
    %8 = vector.shape_cast %7 : vector<128xf32> to vector<1x128xf32>
    %9 = tpu.iota {dimensions = array<i32: 0>} : vector<8x128xi32>
    %c0_i32 = arith.constant 0 : i32
    %10 = vector.broadcast %c0_i32 : i32 to vector<8x128xi32>
    %11 = arith.cmpi eq, %9, %10 : vector<8x128xi32>
    %cst_7 = arith.constant 0.000000e+00 : f32
    %12 = vector.shape_cast %5 : vector<1x128xf32> to vector<1x128xf32>
    %13 = vector.broadcast %12 : vector<1x128xf32> to vector<8x128xf32>
    %14 = vector.broadcast %cst_7 : f32 to vector<8x128xf32>
    %15 = arith.select %11, %13, %14 : vector<8x128xi1>, vector<8x128xf32>
    %c1_i32 = arith.constant 1 : i32
    %16 = vector.broadcast %c1_i32 : i32 to vector<8x128xi32>
    %17 = arith.cmpi eq, %9, %16 : vector<8x128xi32>
    %cst_8 = arith.constant 0.000000e+00 : f32
    %18 = vector.shape_cast %8 : vector<1x128xf32> to vector<1x128xf32>
    %19 = vector.broadcast %18 : vector<1x128xf32> to vector<8x128xf32>
    %20 = vector.broadcast %cst_8 : f32 to vector<8x128xf32>
    %21 = arith.select %17, %19, %20 : vector<8x128xi1>, vector<8x128xf32>
    %22 = arith.addf %15, %21 : vector<8x128xf32>
    %c0_9 = arith.constant 0 : index
    %c0_10 = arith.constant 0 : index
    %23 = vector.load %arg4[%c0_9, %c0_10] : memref<8x128xf32, #tpu.memory_space<vmem>>, vector<8x128xf32>
    tpu.vector_store %arg4[%c0_9, %c0_10], %22 {strides = array<i32>} : memref<8x128xf32, #tpu.memory_space<vmem>>, vector<8x128xf32>,
    return
  }
  func.func @transform_0(%arg0: i32) -> (i32, i32) {
    %c0_i32 = arith.constant 0 : i32
    %c0_i32_0 = arith.constant 0 : i32
    return %arg0, %c0_i32 : i32, i32
  }
  func.func @transform_1(%arg0: i32) -> (i32, i32) {
    %c0_i32 = arith.constant 0 : i32
    %c0_i32_0 = arith.constant 0 : i32
    %c0_i32_1 = arith.constant 0 : i32
    return %c0_i32, %c0_i32_0 : i32, i32
  }
  func.func @transform_2(%arg0: i32) -> (i32, i32) {
    %c0_i32 = arith.constant 0 : i32
    %c0_i32_0 = arith.constant 0 : i32
    return %arg0, %c0_i32 : i32, i32
  }
  func.func @transform_3(%arg0: i32) -> (i32, i32) {
    %c0_i32 = arith.constant 0 : i32
    %c0_i32_0 = arith.constant 0 : i32
    return %arg0, %c0_i32 : i32, i32
  }
}

</mosaic_0001>

<bundles_post_ra>
// kernel: tpu_custom_call.1
= control target key start
LH: loop header
LB: loop body
LE: loop exit
PB: predicated region body
PF: predicated region fallthrough
CT: control target
= control target key end

     0   :  { %9 = vsyncpa [#allocation3], 0  ;;  %s847_s0 = inlined_call_operand.hbm [shape: bf16[128,256], index: 0, kind: input, shape index: {}]   ;;  %s848_s1 = inlined_call_operand.hbm [shape: bf16[256,128], index: 1, kind: input, shape index: {}]   ;;  %s849_s2 = inlined_call_operand.hbm [shape: f32[128,128], index: 2, kind: output, shape index: {0}]   ;;  %s850_s3 = inlined_call_operand.hbm [shape: f32[8,128], index: 3, kind: output, shape index: {1}]  }
   0x1   :  { %10 = vsyncpa [#allocation6], 0 }
   0x2   :  { %11 = vsyncpa [#allocation4], 0 }
   0x3   :  { %12 = vsyncpa [#allocation9], 0  ;;  %s735_s12 = smov [#allocation2]   ;;  %s639_s16 = scalar_lea.hbm %s847_s0, 2048 }
   0x4   :  { %s18_s13 = sshll.u32 %s735_s12, 4  ;;  %p640_p0 = scmp.ne.s32.totalorder %s847_s0, %s639_s16  ;;  %s19_s13 = int_to_ptr.vmem [resolvable:$true] %s18_s13 }
   0x5   :  { %p643_p1 = scmp.lt.u32.totalorder %s639_s16, %s847_s0 }
   0x7   :  { %p645_p2 = pnand %p643_p1, %p640_p0 }
   0x9   :  { %648 = shalt.err (!%p645_p2)
}
   0xa   :  { %s649_s21 = scalar_lea.vmem %s19_s13, 2048  ;;  %p654_p4 = scmp.lt.s32.totalorder %s19_s13, %s19_s13 }
   0xb   :  { %p650_p3 = scmp.ne.s32.totalorder %s19_s13, %s649_s21  ;;  %p655_p5 = scmp.lt.s32.totalorder %s649_s21, %s649_s21 }
   0xd   :  { %p656_p6 = por %p655_p5, %p654_p4 }
   0xf   :  { %p657_p7 = pnand %p656_p6, %p650_p3 }
  0x11   :  { %660 = shalt.err (!%p657_p7)
}
  0x12   :  { %s736_s22 = smov 128   ;;  %s737_s23 = smov 8  }
  0x13   :  { %24 = dma.hbm_to_vmem [thread:$0]  %s847_s0, 2048, %s19_s13, [#allocation3], %s736_s22, %s736_s22, %s737_s23  }
  0x14   :  { %s738_s26 = smov [#allocation5]   ;;  %s661_s30 = scalar_lea.hbm %s848_s1, 2048 }
  0x15   :  { %s30_s27 = sshll.u32 %s738_s26, 4  ;;  %p662_p8 = scmp.ne.s32.totalorder %s848_s1, %s661_s30  ;;  %s31_s27 = int_to_ptr.vmem [resolvable:$true] %s30_s27 }
  0x16   :  { %p665_p9 = scmp.lt.u32.totalorder %s661_s30, %s848_s1 }
  0x18   :  { %p667_p10 = pnand %p665_p9, %p662_p8 }
  0x1a   :  { %670 = shalt.err (!%p667_p10)
}
  0x1b   :  { %s671_s8 = scalar_lea.vmem %s31_s27, 2048  ;;  %p676_p12 = scmp.lt.s32.totalorder %s31_s27, %s31_s27 }
  0x1c   :  { %p672_p11 = scmp.ne.s32.totalorder %s31_s27, %s671_s8  ;;  %p677_p13 = scmp.lt.s32.totalorder %s671_s8, %s671_s8 }
  0x1e   :  { %p678_p0 = por %p677_p13, %p676_p12 }
  0x20   :  { %p679_p1 = pnand %p678_p0, %p672_p11 }
  0x22   :  { %682 = shalt.err (!%p679_p1)
}
  0x23   :  { %s739_s0 = smov 64   ;;  %s740_s9 = smov 4  }
  0x24   :  { %36 = dma.hbm_to_vmem [thread:$0]  %s848_s1, 2048, %s31_s27, [#allocation6], %s739_s0, %s739_s0, %s740_s9  }
  0x25   :  { %727 = dma.done.wait [#allocation3], 2048  }
  0x26   :  { %728 = vsyncadd [#allocation3], 4294965248 }
  0x27   :  { %729 = dma.done.wait [#allocation6], 2048  }
  0x28   :  { %730 = vsyncadd [#allocation6], 4294965248  ;;  %v599_v0 = vld [vmem:[#allocation5 + $0x40] sm:$0xff]   ;;  %v601_v2 = vld [vmem:[#allocation5 + $0x48] sm:$0xff]   ;;  %s741_s1 = smov [#allocation7]  }
  0x29   :  { %v600_v1 = vld [vmem:[#allocation5] sm:$0xff]   ;;  %511 = vmatprep.subr.bf16.mxu0 %v599_v0  ;;  %575 = vmatprep.subr.bf16.mxu1 %v599_v0  ;;  %v602_v3 = vld [vmem:[#allocation5 + $0x8] sm:$0xff]   ;;  %v603_v4 = vld [vmem:[#allocation5 + $0x50] sm:$0xff]   ;;  %s452_s12 = sshll.u32 %s741_s1, 4  ;;  %s453_s12 = int_to_ptr.vmem [resolvable:$true] %s452_s12 }
  0x2a   :  { %512 = vmatpush3.bf16.msra.mxu0 %v600_v1  ;;  %583 = vmatpush3.bf16.msra.mxu1 %v600_v1  ;;  %v604_v5 = vld [vmem:[#allocation5 + $0x10] sm:$0xff]   ;;  %v605_v6 = vld [vmem:[#allocation5 + $0x58] sm:$0xff]   ;;  %v607_v8 = vld [vmem:[#allocation5 + $0x60] sm:$0xff]   ;;  %s683_s13 = scalar_lea.vmem %s453_s12, 2048  ;;  %p688_p3 = scmp.lt.s32.totalorder %s453_s12, %s453_s12 }
  0x2b   :  { %513 = vmatprep.subr.bf16.mxu0 %v601_v2  ;;  %576 = vmatprep.subr.bf16.mxu1 %v601_v2  ;;  %v606_v7 = vld [vmem:[#allocation5 + $0x18] sm:$0xff]   ;;  %v608_v9 = vld [vmem:[#allocation5 + $0x20] sm:$0xff]   ;;  %v609_v10 = vld [vmem:[#allocation5 + $0x68] sm:$0xff]   ;;  %p684_p2 = scmp.ne.s32.totalorder %s453_s12, %s683_s13  ;;  %p689_p4 = scmp.lt.s32.totalorder %s683_s13, %s683_s13 }
  0x2c   :  { %v617_v11 = vld [vmem:[#allocation2 + $0x4] ss:$8 sps:$4 sm:$0xff]   ;;  %v611_v14 = vld [vmem:[#allocation5 + $0x70] sm:$0xff]   ;;  %v613_v16 = vld [vmem:[#allocation5 + $0x78] sm:$0xff]  }
  0x2d   :  { %v610_v12 = vld [vmem:[#allocation5 + $0x28] sm:$0xff]   ;;  %300 = vmatprep.mubr.bf16.mxu0 %v617_v11  ;;  %v612_v15 = vld [vmem:[#allocation5 + $0x30] sm:$0xff]   ;;  %v614_v17 = vld [vmem:[#allocation5 + $0x38] sm:$0xff]   ;;  %p690_p5 = por %p689_p4, %p688_p3 }
  0x2e   :  { %514 = vmatpush3.bf16.msra.mxu0 %v602_v3  ;;  %584 = vmatpush3.bf16.msra.mxu1 %v602_v3  ;;  %v623_v13 = vld [vmem:[#allocation2 + $0x44] ss:$8 sps:$4 sm:$0xff]   ;;  %v615_v18 = vld [vmem:[#allocation2] ss:$8 sps:$4 sm:$0xff]   ;;  %v618_v20 = vld [vmem:[#allocation2 + $0x14] ss:$8 sps:$4 sm:$0xff]  }
  0x2f   :  { %515 = vmatprep.subr.bf16.mxu0 %v603_v4  ;;  %577 = vmatprep.subr.bf16.mxu1 %v603_v4  ;;  %v621_v19 = vld [vmem:[#allocation2 + $0x40] ss:$8 sps:$4 sm:$0xff]   ;;  %v627_v21 = vld [vmem:[#allocation2 + $0x54] ss:$8 sps:$4 sm:$0xff]   ;;  %v620_v22 = vld [vmem:[#allocation2 + $0x10] ss:$8 sps:$4 sm:$0xff]   ;;  %p691_p6 = pnand %p690_p5, %p684_p2 }
  0x30   :  { %332 = vmatprep.mubr.bf16.mxu1 %v623_v13  ;;  %v629_v23 = vld [vmem:[#allocation2 + $0x50] ss:$8 sps:$4 sm:$0xff]   ;;  %v624_v24 = vld [vmem:[#allocation2 + $0x24] ss:$8 sps:$4 sm:$0xff]   ;;  %v626_v26 = vld [vmem:[#allocation2 + $0x20] ss:$8 sps:$4 sm:$0xff]  }
  0x31   :  { %v633_v25 = vld [vmem:[#allocation2 + $0x64] ss:$8 sps:$4 sm:$0xff]   ;;  %v635_v27 = vld [vmem:[#allocation2 + $0x60] ss:$8 sps:$4 sm:$0xff]   ;;  %v630_v28 = vld [vmem:[#allocation2 + $0x34] ss:$8 sps:$4 sm:$0xff]  }
  0x32   :  { %516 = vmatpush3.bf16.msra.mxu0 %v604_v5  ;;  %585 = vmatpush3.bf16.msra.mxu1 %v604_v5  ;;  %v636_v29 = vld [vmem:[#allocation2 + $0x74] ss:$8 sps:$4 sm:$0xff]   ;;  %v632_v30 = vld [vmem:[#allocation2 + $0x30] ss:$8 sps:$4 sm:$0xff]  }
  0x33   :  { %517 = vmatprep.subr.bf16.mxu0 %v605_v6  ;;  %578 = vmatprep.subr.bf16.mxu1 %v605_v6  ;;  %v638_v31 = vld [vmem:[#allocation2 + $0x70] ss:$8 sps:$4 sm:$0xff]  }
  0x36   :  { %518 = vmatpush3.bf16.msra.mxu0 %v606_v7  ;;  %586 = vmatpush3.bf16.msra.mxu1 %v606_v7 }
  0x37   :  { %519 = vmatprep.subr.bf16.mxu0 %v607_v8  ;;  %579 = vmatprep.subr.bf16.mxu1 %v607_v8 }
  0x3a   :  { %520 = vmatpush3.bf16.msra.mxu0 %v608_v9  ;;  %587 = vmatpush3.bf16.msra.mxu1 %v608_v9 }
  0x3b   :  { %521 = vmatprep.subr.bf16.mxu0 %v609_v10  ;;  %580 = vmatprep.subr.bf16.mxu1 %v609_v10 }
  0x3e   :  { %522 = vmatpush3.bf16.msra.mxu0 %v610_v12  ;;  %588 = vmatpush3.bf16.msra.mxu1 %v610_v12 }
  0x3f   :  { %523 = vmatprep.subr.bf16.mxu0 %v611_v14  ;;  %581 = vmatprep.subr.bf16.mxu1 %v611_v14 }
  0x42   :  { %524 = vmatpush3.bf16.msra.mxu0 %v612_v15  ;;  %589 = vmatpush3.bf16.msra.mxu1 %v612_v15 }
  0x43   :  { %525 = vmatprep.subr.bf16.mxu0 %v613_v16  ;;  %582 = vmatprep.subr.bf16.mxu1 %v613_v16 }
  0x46   :  { %526 = vmatpush3.bf16.msra.mxu0 %v614_v17  ;;  %590 = vmatpush3.bf16.msra.mxu1 %v614_v17 }
  0x49   :  { %301 = vmatmul.mubr.bf16.vlgmr.msra.gmra.mrb[0].mxu0 %v615_v18  ;;  %333 = vmatmul.mubr.bf16.vlgmr.msra.gmra.mrb[0].mxu1 %v621_v19 }
  0x4a   :  { %308 = vmatprep.mubr.bf16.mxu0 %v618_v20  ;;  %340 = vmatprep.mubr.bf16.mxu1 %v627_v21 }
  0x51   :  { %309 = vmatmul.mubr.bf16.gmra.mrb[4].mxu0 %v620_v22  ;;  %341 = vmatmul.mubr.bf16.gmra.mrb[4].mxu1 %v629_v23 }
  0x52   :  { %316 = vmatprep.mubr.bf16.mxu0 %v624_v24  ;;  %348 = vmatprep.mubr.bf16.mxu1 %v633_v25 }
  0x59   :  { %317 = vmatmul.mubr.bf16.gmra.mrb[8].mxu0 %v626_v26  ;;  %349 = vmatmul.mubr.bf16.gmra.mrb[8].mxu1 %v635_v27 }
  0x5a   :  { %324 = vmatprep.mubr.bf16.mxu0 %v630_v28  ;;  %356 = vmatprep.mubr.bf16.mxu1 %v636_v29 }
  0x61   :  { %325 = vmatmul.mubr.bf16.gmra.mrb[12].mxu0 %v632_v30  ;;  %357 = vmatmul.mubr.bf16.gmra.mrb[12].mxu1 %v638_v31 }
 0x11c   :  { %v527_v32 = vpop.f32.mrb[0].mxu0  ;;  %v551_v33 = vpop.f32.mrb[0].mxu1 }
 0x11d   :  { %v528_v34 = vpop.f32.mrb[1].mxu0  ;;  %v552_v35 = vpop.f32.mrb[1].mxu1 }
 0x11e   :  { %v529_v36 = vadd.f32 %v528_v34, %v527_v32  ;;  %v530_v37 = vpop.f32.mrb[2].mxu0  ;;  %v790_v38 = vadd.f32 %v552_v35, %v551_v33  ;;  %v554_v39 = vpop.f32.mrb[2].mxu1 }
 0x11f   :  { %v531_v40 = vpop.f32.mrb[3].mxu0  ;;  %v555_v41 = vpop.f32.mrb[3].mxu1 }
 0x120   :  { %365 = vst [vmem:[#allocation7] sm:$0xff] %v529_v36  ;;  %v532_v42 = vadd.f32 %v531_v40, %v530_v37  ;;  %373 = vst [vmem:[#allocation7 + $0x40] sm:$0xff] %v790_v38  ;;  %v793_v43 = vadd.f32 %v555_v41, %v554_v39  ;;  %v402_v44 = vmul.f32 %v529_v36, %v529_v36 }
 0x121   :  { %v410_v37 = vmul.f32 %v790_v38, %v790_v38 }
 0x122   :  { %366 = vst [vmem:[#allocation7 + $0x8] sm:$0xff] %v532_v42  ;;  %v381_v45 = vadd.f32 %v532_v42, %v529_v36  ;;  %v403_v46 = vmul.f32 %v532_v42, %v532_v42  ;;  %374 = vst [vmem:[#allocation7 + $0x48] sm:$0xff] %v793_v43 }
 0x124   :  { %v418_v47 = vadd.f32 %v403_v46, %v402_v44  ;;  %v533_v48 = vpop.f32.mrb[4].mxu0  ;;  %v557_v49 = vpop.f32.mrb[4].mxu1 }
 0x125   :  { %v534_v50 = vpop.f32.mrb[5].mxu0  ;;  %v558_v51 = vpop.f32.mrb[5].mxu1 }
 0x126   :  { %v535_v52 = vadd.f32 %v534_v50, %v533_v48  ;;  %v536_v53 = vpop.f32.mrb[6].mxu0  ;;  %v796_v54 = vadd.f32 %v558_v51, %v557_v49  ;;  %v560_v55 = vpop.f32.mrb[6].mxu1 }
 0x127   :  { %v537_v56 = vpop.f32.mrb[7].mxu0  ;;  %v561_v57 = vpop.f32.mrb[7].mxu1 }
 0x128   :  { %367 = vst [vmem:[#allocation7 + $0x10] sm:$0xff] %v535_v52  ;;  %v382_v58 = vadd.f32 %v535_v52, %v381_v45  ;;  %v404_v59 = vmul.f32 %v535_v52, %v535_v52  ;;  %v538_v60 = vadd.f32 %v537_v56, %v536_v53  ;;  %375 = vst [vmem:[#allocation7 + $0x50] sm:$0xff] %v796_v54 }
 0x129   :  { %v799_v61 = vadd.f32 %v561_v57, %v560_v55 }
 0x12a   :  { %v419_v62 = vadd.f32 %v418_v47, %v404_v59  ;;  %368 = vst [vmem:[#allocation7 + $0x18] sm:$0xff] %v538_v60  ;;  %v383_v63 = vadd.f32 %v538_v60, %v382_v58  ;;  %v405_v0 = vmul.f32 %v538_v60, %v538_v60 }
 0x12b   :  { %376 = vst [vmem:[#allocation7 + $0x58] sm:$0xff] %v799_v61 }
 0x12c   :  { %v420_v1 = vadd.f32 %v419_v62, %v405_v0  ;;  %v539_v2 = vpop.f32.mrb[8].mxu0  ;;  %v563_v3 = vpop.f32.mrb[8].mxu1 }
 0x12d   :  { %v540_v4 = vpop.f32.mrb[9].mxu0  ;;  %v564_v5 = vpop.f32.mrb[9].mxu1 }
 0x12e   :  { %v541_v6 = vadd.f32 %v540_v4, %v539_v2  ;;  %v542_v7 = vpop.f32.mrb[10].mxu0  ;;  %v802_v8 = vadd.f32 %v564_v5, %v563_v3  ;;  %v566_v9 = vpop.f32.mrb[10].mxu1 }
 0x12f   :  { %v543_v10 = vpop.f32.mrb[11].mxu0  ;;  %v567_v11 = vpop.f32.mrb[11].mxu1 }
 0x130   :  { %369 = vst [vmem:[#allocation7 + $0x20] sm:$0xff] %v541_v6  ;;  %v384_v12 = vadd.f32 %v541_v6, %v383_v63  ;;  %v406_v13 = vmul.f32 %v541_v6, %v541_v6  ;;  %v544_v14 = vadd.f32 %v543_v10, %v542_v7  ;;  %377 = vst [vmem:[#allocation7 + $0x60] sm:$0xff] %v802_v8 }
 0x131   :  { %v568_v15 = vadd.f32 %v567_v11, %v566_v9 }
 0x132   :  { %v421_v16 = vadd.f32 %v420_v1, %v406_v13  ;;  %370 = vst [vmem:[#allocation7 + $0x28] sm:$0xff] %v544_v14  ;;  %v385_v17 = vadd.f32 %v544_v14, %v384_v12  ;;  %v407_v18 = vmul.f32 %v544_v14, %v544_v14 }
 0x133   :  { %378 = vst [vmem:[#allocation7 + $0x68] sm:$0xff] %v568_v15 }
 0x134   :  { %v422_v19 = vadd.f32 %v421_v16, %v407_v18  ;;  %v545_v20 = vpop.f32.mrb[12].mxu0  ;;  %v569_v21 = vpop.f32.mrb[12].mxu1 }
 0x135   :  { %v546_v22 = vpop.f32.mrb[13].mxu0  ;;  %v570_v23 = vpop.f32.mrb[13].mxu1 }
 0x136   :  { %v547_v24 = vadd.f32 %v546_v22, %v545_v20  ;;  %v548_v25 = vpop.f32.mrb[14].mxu0  ;;  %v571_v26 = vadd.f32 %v570_v23, %v569_v21  ;;  %v572_v27 = vpop.f32.mrb[14].mxu1 }
 0x137   :  { %v549_v28 = vpop.f32.mrb[15].mxu0  ;;  %v573_v29 = vpop.f32.mrb[15].mxu1 }
 0x138   :  { %371 = vst [vmem:[#allocation7 + $0x30] sm:$0xff] %v547_v24  ;;  %v386_v30 = vadd.f32 %v547_v24, %v385_v17  ;;  %v408_v31 = vmul.f32 %v547_v24, %v547_v24  ;;  %v550_v32 = vadd.f32 %v549_v28, %v548_v25  ;;  %379 = vst [vmem:[#allocation7 + $0x70] sm:$0xff] %v571_v26 }
 0x139   :  { %v574_v33 = vadd.f32 %v573_v29, %v572_v27 }
 0x13a   :  { %v423_v34 = vadd.f32 %v422_v19, %v408_v31  ;;  %372 = vst [vmem:[#allocation7 + $0x38] sm:$0xff] %v550_v32  ;;  %v387_v35 = vadd.f32 %v550_v32, %v386_v30  ;;  %v409_v36 = vmul.f32 %v550_v32, %v550_v32 }
 0x13b   :  { %380 = vst [vmem:[#allocation7 + $0x78] sm:$0xff] %v574_v33 }
 0x13c   :  { %v388_v39 = vadd.f32 %v790_v38, %v387_v35  ;;  %v424_v40 = vadd.f32 %v423_v34, %v409_v36 }
 0x13d   :  { %694 = shalt.err (!%p691_p6)
}
 0x13e   :  { %s695_s16 = scalar_lea.hbm %s849_s2, 2048 }
 0x13f   :  { %p696_p7 = scmp.ne.s32.totalorder %s849_s2, %s695_s16  ;;  %p699_p8 = scmp.lt.u32.totalorder %s695_s16, %s849_s2 }
 0x141   :  { %p701_p9 = pnand %p699_p8, %p696_p7 }
 0x143   :  { %704 = shalt.err (!%p701_p9)
}
 0x144   :  { %458 = dma.vmem_to_hbm [thread:$0]  %s453_s12, 2048, %s849_s2, [#allocation4], %s736_s22, %s736_s22, %s737_s23   ;;  %v411_v38 = vmul.f32 %v793_v43, %v793_v43  ;;  %v389_v41 = vadd.f32 %v793_v43, %v388_v39  ;;  %v425_v42 = vadd.f32 %v424_v40, %v410_v37  ;;  %v412_v44 = vmul.f32 %v796_v54, %v796_v54 }
 0x145   :  { %v413_v47 = vmul.f32 %v799_v61, %v799_v61  ;;  %v414_v51 = vmul.f32 %v802_v8, %v802_v8  ;;  %v415_v55 = vmul.f32 %v568_v15, %v568_v15  ;;  %v416_v56 = vmul.f32 %v571_v26, %v571_v26  ;;  %s742_s2 = smov [#allocation8]  }
 0x146   :  { %v426_v45 = vadd.f32 %v425_v42, %v411_v38  ;;  %v390_v46 = vadd.f32 %v796_v54, %v389_v41  ;;  %v417_v60 = vmul.f32 %v574_v33, %v574_v33  ;;  %v439_v1 = vlaneseq  ;;  %s465_s22 = sshll.u32 %s742_s2, 4  ;;  %s466_s22 = int_to_ptr.vmem [resolvable:$true] %s465_s22 }
 0x147   :  { %s705_s23 = scalar_lea.vmem %s466_s22, 128  ;;  %p710_p11 = scmp.lt.s32.totalorder %s466_s22, %s466_s22 }
 0x148   :  { %v391_v48 = vadd.f32 %v799_v61, %v390_v46  ;;  %v427_v49 = vadd.f32 %v426_v45, %v412_v44  ;;  %v440_v6 = vshrl.u32 %v439_v1, 7  ;;  %p706_p10 = scmp.ne.s32.totalorder %s466_s22, %s705_s23  ;;  %p711_p12 = scmp.lt.s32.totalorder %s705_s23, %s705_s23 }
 0x14a   :  { %v392_v50 = vadd.f32 %v802_v8, %v391_v48  ;;  %v428_v52 = vadd.f32 %v427_v49, %v413_v47  ;;  %vm441_vm0 = vcmp.eq.s32.totalorder %v440_v6, 0  ;;  %vm443_vm1 = vcmp.eq.s32.totalorder %v440_v6, 1  ;;  %p712_p13 = por %p711_p12, %p710_p11 }
 0x14c   :  { %v429_v43 = vadd.f32 %v428_v52, %v414_v51  ;;  %v393_v53 = vadd.f32 %v568_v15, %v392_v50  ;;  %p713_p0 = pnand %p712_p13, %p706_p10 }
 0x14e   :  { %v430_v57 = vadd.f32 %v429_v43, %v415_v55  ;;  %v394_v58 = vadd.f32 %v571_v26, %v393_v53 }
 0x150   :  { %v431_v59 = vadd.f32 %v430_v57, %v416_v56  ;;  %v395_v54 = vadd.f32 %v574_v33, %v394_v58 }
 0x152   :  { %v396_v62 = vrot.slane %v395_v54, 4  ;;  %v432_v63 = vadd.f32 %v431_v59, %v417_v60 }
 0x154   :  { %v397_v0 = vadd.f32 %v396_v62, %v395_v54  ;;  %v433_v61 = vrot.slane %v432_v63, 4 }
 0x156   :  { %v398_v2 = vrot.slane %v397_v0, 2  ;;  %v434_v3 = vadd.f32 %v433_v61, %v432_v63 }
 0x158   :  { %v399_v4 = vadd.f32 %v398_v2, %v397_v0  ;;  %v435_v5 = vrot.slane %v434_v3, 2 }
 0x15a   :  { %v400_v7 = vrot.slane %v399_v4, 1  ;;  %v436_v8 = vadd.f32 %v435_v5, %v434_v3 }
 0x15c   :  { %v401_v9 = vadd.f32 %v400_v7, %v399_v4  ;;  %v437_v10 = vrot.slane %v436_v8, 1 }
 0x15e   :  { %v438_v11 = vadd.f32 %v437_v10, %v436_v8  ;;  %v442_v12 = vsel %vm441_vm0, %v401_v9, 0.0 }
 0x160   :  { %v444_v13 = vsel %vm443_vm1, %v438_v11, 0.0 }
 0x161   :  { %v445_v14 = vadd.f32 %v444_v13, %v442_v12 }
 0x163   :  { %446 = vst [vmem:[#allocation8] sm:$0xff] %v445_v14 }
 0x164   :  { %716 = shalt.err (!%p713_p0)
}
 0x165   :  { %s717_s27 = scalar_lea.hbm %s850_s3, 128 }
 0x166   :  { %p718_p1 = scmp.ne.s32.totalorder %s850_s3, %s717_s27  ;;  %p721_p2 = scmp.lt.u32.totalorder %s717_s27, %s850_s3 }
 0x168   :  { %p723_p3 = pnand %p721_p2, %p718_p1 }
 0x16a   :  { %726 = shalt.err (!%p723_p3)
}
 0x16b   :  { %468 = dma.vmem_to_hbm [thread:$0]  %s466_s22, 128, %s850_s3, [#allocation9]  }
 0x16c   :  { %731 = dma.done.wait [#allocation4], 2048  }
 0x16d   :  { %732 = vsyncadd [#allocation4], 4294965248 }
 0x16e   :  { %733 = dma.done.wait [#allocation9], 128  }
 0x16f   :  { %734 = vsyncadd [#allocation9], 4294967168 }
 0x170   :  { %475 = vsyncpa [#allocation3], 1 }
 0x171   :  { %476 = vsyncpa [#allocation6], 1 }
 0x172   :  { %477 = vsyncpa [#allocation4], 1 }
 0x173   :  { %478 = vsyncpa [#allocation9], 1 }

</bundles_post_ra>
